<compile_context>
chip_gen: v7x
topology: tpu7x:2x2x1
jax: 0.10.0
libtpu: 0.0.40
codegen_flags: <defaults>
</compile_context>

<pallas_src>
import jax
import jax.numpy as jnp
from jax.experimental import pallas as pl
from jax.experimental.pallas import tpu as pltpu


def _orthogonal_fusion_kernel(g_row_ref, g_col_ref, inv_ref, l_ref, out_ref):
    # Per-grid-step blocks (one batch element, one HW tile):
    #   g_row_ref : [1, 1, C]   (resident across HW tiles, local dtype)
    #   g_col_ref : [1, C, 1]   (resident across HW tiles, local dtype)
    #   inv_ref   : [1, 1, 1]   f32, 1 / ||g||^2 for this batch
    #   l_ref     : [1, C, T_HW]
    #   out_ref   : [1, 2C, T_HW]
    g_row = g_row_ref[0]                       # [1, C], native dtype
    g_col = g_col_ref[0]                       # [C, 1], native dtype
    L = l_ref[0]                               # [C, T], native dtype
    C, T = L.shape

    # s = g . L_tile -> [1, T]  (MXU matvec, f32 accumulation, no pre-cast of L).
    s = jnp.dot(g_row, L, preferred_element_type=jnp.float32)

    # Scale the [1, T] vector by the precomputed 1/||g||^2 (no in-kernel reduce).
    s_scaled = s * inv_ref[0]                  # (1,1) broadcast over (1,T)

    # Rank-1 projection fused as a VPU broadcast multiply-subtract.
    # Single f32 copy of L (no-op cast for f32 inputs).
    orth = L.astype(jnp.float32) - g_col.astype(jnp.float32) * s_scaled

    # First C output channels: broadcast global feature, written directly in
    # the output dtype (no f32 round trip).
    out_ref[0, :C, :] = jnp.broadcast_to(g_col, (C, T)).astype(out_ref.dtype)
    # Last C output channels: orthogonal component.
    out_ref[0, C:, :] = orth.astype(out_ref.dtype)


def _plan_tiling(B, C, HW, itemsize):
    """Returns (vmem_limit_bytes, T_HW) — generation-aware VMEM budget + lane tile."""
    try:
        info = pltpu.get_tpu_info()
        phys_vmem = getattr(info, "vmem_capacity_bytes", None) or 128 * 1024 * 1024
    except Exception:  # pragma: no cover - fallback when not queryable
        phys_vmem = 128 * 1024 * 1024
    # 48 MiB on 128-MiB-VMEM chips (v5e/v6e), 32 MiB on v7x (64 MiB physical).
    vmem_limit = min(48 * 1024 * 1024, phys_vmem // 2)
    budget = vmem_limit // 2  # double-buffered in+out working-set budget

    # Per-step double-buffered footprint ~= 2 * (C*T + 2C*T) * itemsize = 6*C*T*itemsize.
    max_t = budget // (6 * C * itemsize)
    max_t = (max_t // 128) * 128
    if max_t < 128:
        raise ValueError(
            f"OrthogonalFusion: C={C} is too large for the VMEM budget "
            f"({budget} bytes); even a 128-lane tile does not fit.")

    hw_ceil = ((HW + 127) // 128) * 128
    t = min(max_t, 2048, hw_ceil)

    # Guarantee enough grid steps for megacore sharding (v7x: 2 TCs) and for
    # DMA/compute/writeback overlap: aim for >= 8 total steps, floor T at 256.
    min_steps = 8
    while t > 256 and B * pl.cdiv(HW, t) < min_steps:
        nt = max(256, ((t // 2) // 128) * 128)
        if nt >= t:
            break
        t = nt
    return vmem_limit, t


def orthogonal_fusion(local_feat, global_feat):
    """local_feat: [B, C, H, W], global_feat: [B, C] -> [B, 2C, H, W]."""
    B, C, H, W = local_feat.shape
    HW = H * W
    dtype = local_feat.dtype

    local_flat = local_feat.reshape(B, C, HW)
    g = global_feat.astype(dtype)
    g_row = g.reshape(B, 1, C)
    g_col = g.reshape(B, C, 1)

    # Per-batch 1/||g||^2 in f32 (tiny [B] reduce in the wrapper, kernel just
    # multiplies).  Matches the reference's exact division (no approx recip).
    g32 = global_feat.astype(jnp.float32)
    inv_norm_sq = (1.0 / jnp.sum(g32 * g32, axis=1)).reshape(B, 1, 1)

    itemsize = jnp.dtype(dtype).itemsize
    vmem_limit, T_HW = _plan_tiling(B, C, HW, itemsize)
    grid = (B, pl.cdiv(HW, T_HW))  # last HW tile may be partial -> masked store

    out_flat = pl.pallas_call(
        _orthogonal_fusion_kernel,
        out_shape=jax.ShapeDtypeStruct((B, 2 * C, HW), dtype),
        grid_spec=pltpu.PrefetchScalarGridSpec(
            num_scalar_prefetch=0,
            grid=grid,
            in_specs=[
                # g / inv blocks ignore the HW-tile axis -> resident across tiles.
                pl.BlockSpec((1, 1, C), lambda b, t: (b, 0, 0)),
                pl.BlockSpec((1, C, 1), lambda b, t: (b, 0, 0)),
                pl.BlockSpec((1, 1, 1), lambda b, t: (b, 0, 0)),
                pl.BlockSpec((1, C, T_HW), lambda b, t: (b, 0, t)),
            ],
            out_specs=pl.BlockSpec((1, 2 * C, T_HW), lambda b, t: (b, 0, t)),
        ),
        compiler_params=pltpu.CompilerParams(
            # Both axes are fully independent -> parallel (megacore sharding).
            dimension_semantics=("parallel", "parallel"),
            vmem_limit_bytes=vmem_limit,
        ),
    )(g_row, g_col, inv_norm_sq, local_flat)

    return out_flat.reshape(B, 2 * C, H, W)


def _reference(local_feat, global_feat):
    # Pure-JAX reference mirroring the PyTorch forward exactly.
    B, C, H, W = local_feat.shape
    g = global_feat
    norm_sq = jnp.sum(g * g, axis=1)                                   # [B]
    l_flat = local_feat.reshape(B, C, H * W)                           # [B, C, HW]
    proj = jnp.einsum("bc,bck->bk", g, l_flat)                         # [B, HW]
    proj = jnp.einsum("bc,bk->bck", g, proj).reshape(B, C, H, W)
    proj = proj / norm_sq.reshape(-1, 1, 1, 1)
    orth = local_feat - proj
    g_exp = jnp.broadcast_to(g[:, :, None, None], (B, C, H, W))
    return jnp.concatenate([g_exp, orth], axis=1)


if __name__ == "__main__":
    key = jax.random.PRNGKey(0)
    k1, k2, k3, k4 = jax.random.split(key, 4)

    # Shape 1: HW already a multiple of 128.
    B, C, H, W = 2, 4, 16, 16
    local_feat = jax.random.normal(k1, (B, C, H, W), dtype=jnp.float32)
    global_feat = jax.random.normal(k2, (B, C), dtype=jnp.float32)
    out = jax.block_until_ready(orthogonal_fusion(local_feat, global_feat))
    ref = _reference(local_feat, global_feat)
    assert out.shape == (B, 2 * C, H, W)
    assert jnp.allclose(out, ref, atol=1e-5, rtol=1e-5), "mismatch vs reference (16x16)"

    # Shape 2: ragged spatial dims (7x7=49) -> exercises the masked partial-tile path.
    B2, C2, H2, W2 = 2, 8, 7, 7
    local_feat2 = jax.random.normal(k3, (B2, C2, H2, W2), dtype=jnp.float32)
    global_feat2 = jax.random.normal(k4, (B2, C2), dtype=jnp.float32)
    out2 = jax.block_until_ready(orthogonal_fusion(local_feat2, global_feat2))
    ref2 = _reference(local_feat2, global_feat2)
    assert out2.shape == (B2, 2 * C2, H2, W2)
    assert jnp.allclose(out2, ref2, atol=1e-5, rtol=1e-5), "mismatch vs reference (7x7)"

    print("KERNEL_OK")
</pallas_src>

<mosaic_0001>
module attributes {stable_mosaic.version = 11 : i64} {
  func.func @_orthogonal_fusion_kernel(%arg0: i32, %arg1: i32, %arg2: memref<1x1x4xf32, #tpu.memory_space<vmem>>, %arg3: memref<1x4x1xf32, #tpu.memory_space<vmem>>, %arg4: memref<1x1x1xf32, #tpu.memory_space<vmem>>, %arg5: memref<1x4x256xf32, #tpu.memory_space<vmem>>, %arg6: memref<1x8x256xf32, #tpu.memory_space<vmem>>) attributes {dimension_semantics = [#tpu.dimension_semantics<parallel>, #tpu.dimension_semantics<parallel>], iteration_bounds = array<i64: 2, 1>, scalar_prefetch = 0 : i64, scratch_operands = 0 : i64, tpu.core_type = #tpu.core_type<tc>, window_params = [{transform_indices = @transform_0, window_bounds = array<i64: 1, 1, 4>}, {transform_indices = @transform_1, window_bounds = array<i64: 1, 4, 1>}, {transform_indices = @transform_2, window_bounds = array<i64: 1, 1, 1>}, {transform_indices = @transform_3, window_bounds = array<i64: 1, 4, 256>}, {transform_indices = @transform_4, window_bounds = array<i64: 1, 8, 256>}]} {
    %c0 = arith.constant 0 : index
    %c0_0 = arith.constant 0 : index
    %c0_1 = arith.constant 0 : index
    %0 = vector.load %arg2[%c0, %c0_0, %c0_1] : memref<1x1x4xf32, #tpu.memory_space<vmem>>, vector<1x1x4xf32>
    %1 = vector.shape_cast %0 : vector<1x1x4xf32> to vector<1x4xf32>
    %c0_2 = arith.constant 0 : index
    %c0_3 = arith.constant 0 : index
    %c0_4 = arith.constant 0 : index
    %2 = vector.load %arg3[%c0_2, %c0_3, %c0_4] : memref<1x4x1xf32, #tpu.memory_space<vmem>>, vector<1x4x1xf32>
    %3 = vector.shape_cast %2 : vector<1x4x1xf32> to vector<4x1xf32>
    %c0_5 = arith.constant 0 : index
    %c0_6 = arith.constant 0 : index
    %c0_7 = arith.constant 0 : index
    %4 = vector.load %arg5[%c0_5, %c0_6, %c0_7] : memref<1x4x256xf32, #tpu.memory_space<vmem>>, vector<1x4x256xf32>
    %5 = vector.shape_cast %4 : vector<1x4x256xf32> to vector<4x256xf32>
    %cst = arith.constant dense<0.000000e+00> : vector<1x256xf32>
    %6 = tpu.matmul %1, %5, %cst {dimension_numbers = #tpu.dot_dimension_numbers<[1], [0], [0], [1], [0, 0, 1, 1], [], []>} : vector<1x4xf32>, vector<4x256xf32>, vector<1x256xf32> -> vector<1x256xf32>
    %c0_8 = arith.constant 0 : index
    %c0_9 = arith.constant 0 : index
    %c0_10 = arith.constant 0 : index
    %7 = vector.load %arg4[%c0_8, %c0_9, %c0_10] : memref<1x1x1xf32, #tpu.memory_space<vmem>>, vector<1x1x1xf32>
    %8 = vector.shape_cast %7 : vector<1x1x1xf32> to vector<1x1xf32>
    %9 = vector.broadcast %8 : vector<1x1xf32> to vector<1x256xf32>
    %10 = arith.mulf %6, %9 : vector<1x256xf32>
    %11 = vector.broadcast %3 : vector<4x1xf32> to vector<4x256xf32>
    %12 = vector.broadcast %10 : vector<1x256xf32> to vector<4x256xf32>
    %13 = arith.mulf %11, %12 : vector<4x256xf32>
    %14 = arith.subf %5, %13 : vector<4x256xf32>
    %15 = vector.shape_cast %3 : vector<4x1xf32> to vector<4x1xf32>
    %16 = vector.broadcast %15 : vector<4x1xf32> to vector<4x256xf32>
    %c0_11 = arith.constant 0 : index
    %c0_12 = arith.constant 0 : index
    %c0_13 = arith.constant 0 : index
    %17 = vector.load %arg6[%c0_11, %c0_12, %c0_13] : memref<1x8x256xf32, #tpu.memory_space<vmem>>, vector<1x4x256xf32>
    %18 = vector.shape_cast %17 : vector<1x4x256xf32> to vector<4x256xf32>
    %19 = vector.shape_cast %16 : vector<4x256xf32> to vector<1x4x256xf32>
    tpu.vector_store %arg6[%c0_11, %c0_12, %c0_13], %19 {strides = array<i32>} : memref<1x8x256xf32, #tpu.memory_space<vmem>>, vector<1x4x256xf32>,
    %c0_14 = arith.constant 0 : index
    %c4 = arith.constant 4 : index
    %c0_15 = arith.constant 0 : index
    %20 = vector.load %arg6[%c0_14, %c4, %c0_15] : memref<1x8x256xf32, #tpu.memory_space<vmem>>, vector<1x4x256xf32>
    %21 = vector.shape_cast %20 : vector<1x4x256xf32> to vector<4x256xf32>
    %22 = vector.shape_cast %14 : vector<4x256xf32> to vector<1x4x256xf32>
    tpu.vector_store %arg6[%c0_14, %c4, %c0_15], %22 {strides = array<i32>} : memref<1x8x256xf32, #tpu.memory_space<vmem>>, vector<1x4x256xf32>,
    return
  }
  func.func @transform_0(%arg0: i32, %arg1: i32) -> (i32, i32, i32) {
    %c0_i32 = arith.constant 0 : i32
    %c0_i32_0 = arith.constant 0 : i32
    %c0_i32_1 = arith.constant 0 : i32
    return %arg0, %c0_i32, %c0_i32_0 : i32, i32, i32
  }
  func.func @transform_1(%arg0: i32, %arg1: i32) -> (i32, i32, i32) {
    %c0_i32 = arith.constant 0 : i32
    %c0_i32_0 = arith.constant 0 : i32
    %c0_i32_1 = arith.constant 0 : i32
    return %arg0, %c0_i32, %c0_i32_0 : i32, i32, i32
  }
  func.func @transform_2(%arg0: i32, %arg1: i32) -> (i32, i32, i32) {
    %c0_i32 = arith.constant 0 : i32
    %c0_i32_0 = arith.constant 0 : i32
    %c0_i32_1 = arith.constant 0 : i32
    return %arg0, %c0_i32, %c0_i32_0 : i32, i32, i32
  }
  func.func @transform_3(%arg0: i32, %arg1: i32) -> (i32, i32, i32) {
    %c0_i32 = arith.constant 0 : i32
    %c0_i32_0 = arith.constant 0 : i32
    return %arg0, %c0_i32, %arg1 : i32, i32, i32
  }
  func.func @transform_4(%arg0: i32, %arg1: i32) -> (i32, i32, i32) {
    %c0_i32 = arith.constant 0 : i32
    %c0_i32_0 = arith.constant 0 : i32
    return %arg0, %c0_i32, %arg1 : i32, i32, i32
  }
}

</mosaic_0001>

<bundles_post_ra>
// kernel: tpu_custom_call.1
= control target key start
LH: loop header
LB: loop body
LE: loop exit
PB: predicated region body
PF: predicated region fallthrough
CT: control target
= control target key end

     0   :  { %9 = vsyncpa [#allocation3], 0  ;;  %s826_s0 = inlined_call_operand.vmem [shape: f32[2,1,4], index: 0, kind: input, shape index: {}]   ;;  %s827_s1 = inlined_call_operand.vmem [shape: f32[2,4,1], index: 1, kind: input, shape index: {}]   ;;  %s828_s2 = inlined_call_operand.vmem [shape: f32[2,1,1], index: 2, kind: input, shape index: {}]   ;;  %s829_s3 = inlined_call_operand.vmem [shape: f32[2,4,256], index: 3, kind: input, shape index: {}]   ;;  %s830_s4 = inlined_call_operand.hbm [shape: f32[2,8,256], index: 4, kind: output, shape index: {}]  }
   0x1   :  { %11 = vsyncpa [#allocation3 + $0x1], 0  ;;  %s705_s15 = smov 0   ;;  %s707_s16 = smov 0  }
   0x2   :  { %s709_s17 = smov 0   ;;  %s711_s18 = smov 0  }
   0x3   :  { %s713_s19 = smov 0   ;;  %s715_s20 = smov 0  }
   0x4 LB: > { %s519_s21 = sadd.s32 4294967295, %s675_s20   ;;  %s520_s22 = sadd.s32 4294967294, %s675_s20   ;;  %s675_s20 = sphi %s715_s20, %s17_s20   ;;  %s671_s19 = sphi %s713_s19, %s837_s19   ;;  %s667_s18 = sphi %s711_s18, %s836_s18   ;;  %s663_s17 = sphi %s709_s17, %s835_s17   ;;  %s659_s16 = sphi %s707_s16, %s834_s16   ;;  %s655_s15 = sphi %s705_s15, %s833_s15  }
   0x5   : > { %s29_s23 = sadd.s32 1, %s671_s19  ;;  %s144_s24 = sadd.s32 1, %s663_s17 }
   0x6   : > { %p31_p0 = scmp.ge.s32.totalorder %s29_s23, 2  ;;  %p154_p1 = scmp.ne.s32.totalorder %s663_s17, %s659_s16 }
   0x7   : > { %p155_p2 = scmp.eq.s32.totalorder %s519_s21, 1  ;;  %p160_p3 = scmp.ne.s32.totalorder %s659_s16, %s655_s15 }
   0x8   : > { %s839_s23 = smov (%p31_p0, %s29_s23), 0  ;;  %p161_p5 = scmp.eq.s32.totalorder %s520_s22, 1 }
   0x9   : > { %p745_p4 = por %p155_p2, %p154_p1  ;;  %s139_s26 = ssub.s32 %s671_s19, %s839_s23 }
   0xa   : > { %p523_p6 = scmp.ge.s32.totalorder %s675_s20, 1  ;;  %p142_p7 = scmp.eq.s32.totalorder %s139_s26, 0 }
   0xb   : > { %p752_p8 = por %p161_p5, %p160_p3  ;;  %p211_p9 = scmp.lt.s32.totalorder %s675_s20, 3 }
   0xc   : > { %s758_s28 = scalar_select %p142_p7, %s663_s17, %s144_s24  }
   0xd   : > { %p212_p10 = pnand %p523_p6, %p211_p9 }
   0xe   : > { %p251_p11 = scmp.lt.s32.totalorder (!%p212_p10), %s667_s18, 1  ;;  %v677_v0 = vmov (!%p212_p10), 0.0   ;;  %v678_v1 = vmov (!%p212_p10), 0   ;;  %vm281_vm0 = vcmask (!%p212_p10), 1043456   ;;  %vm277_vm1 = vcmask (!%p212_p10), 31744   ;;  %s248_s26 = sand.u32 (!%p212_p10), 1, %s659_s16  }
   0xf   : > { %215 = sbr.rel (%p212_p10) target bundleno = 270 (0x10e), region = 36  ;;  %350 = vmatprep.mubr.f32.mxu0 (!%p212_p10), %v677_v0  ;;  %595 = vset.pattern.permute.xlu0 (!%p212_p10), %v678_v1  ;;  %v363_v9 = vlaneseq (!%p212_p10) }
  0x11   : > { %v364_v10 = vshrl.u32 (!%p212_p10), %v363_v9, 7 }
  0x13   : > { %v365_v11 = vsub.s32 (!%p212_p10), 0, %v364_v10 }
  0x16   : > { %s252_s29 = scalar_select %p251_p11, %s667_s18, 1 }
  0x18   : > { %s536_s30 = sshll.u32 %s252_s29, 3  ;;  %s253_s7 = scalar_lea.vmem %s826_s0, %s252_s29 }
  0x19   : > { %s269_s10 = scalar_lea.vmem %s829_s3, %s536_s30  ;;  %s260_s13 = scalar_lea.vmem %s828_s2, %s252_s29  ;;  %v272_v5 = vld [vmem:[%s253_s7] sm:$0x1] }
  0x1a   : > { %v274_v2 = vld [vmem:[%s269_s10] sm:$0xff]  ;;  %s525_s14 = sshll.u32 %s252_s29, 2  ;;  %s524_s30 = sshll.u32 %s248_s26, 4 }
  0x1b   : > { %v357_v3 = vld [vmem:[%s260_s13] sm:$0x1]  ;;  %v276_v4 = vcombine.high %v274_v2, %v274_v2  ;;  %s257_s24 = scalar_lea.vmem %s827_s1, %s525_s14  ;;  %s250_s5 = scalar_lea.vmem [#allocation2], %s524_s30 }
  0x1c   : > { %360 = vperm.xlu0 %595, %v357_v3   ;;  %v273_v6 = vld [vmem:[%s257_s24] sm:$0xf]  ;;  %s537_s29 = sshll.u32 %s667_s18, 8  ;;  %s413_s6 = sshll.u32 %s250_s5, 4  ;;  %s781_s6 = int_to_ptr.vmem [resolvable:$true] %s413_s6 }
  0x1d   : > { %528 = vmatprep.subr.msk.mxu0 %vm281_vm0, %v276_v4  ;;  %s779_s9 = scalar_lea.hbm %s830_s4, %s537_s29  ;;  %s397_s10 = scalar_lea.sflag [#allocation3], %s248_s26 }
  0x1e   : > { %529 = vmatpush1.msk.msra.mxu0 %vm281_vm0, %v274_v2  ;;  %s597_s11 = scalar_lea.vmem %s781_s6, 256  ;;  %s679_s18 = smov [#allocation2]  }
  0x1f   : > { %530 = vmatmul.mubr.msk.f32.vlgmr.msra.gmra.mrb[0].mxu0 %vm277_vm1, %v272_v5  ;;  %p598_p12 = scmp.ne.s32.totalorder %s781_s6, %s597_s11  ;;  %s601_s12 = sshll.u32 %s679_s18, 4  ;;  %s602_s12 = int_to_ptr.vmem [resolvable:$false] %s601_s12 }
  0x20   : > { %371 = vperm.xlu0 %595, %v273_v6   ;;  %s603_s13 = scalar_lea.vmem %s602_s12, 512  ;;  %p604_p1 = scmp.lt.s32.totalorder %s781_s6, %s602_s12 }
  0x21   : > { %p599_p13 = pnand %p598_p12, %p745_p4  ;;  %p605_p2 = scmp.lt.s32.totalorder %s603_s13, %s597_s11 }
  0x23   : > { %p600_p0 = pneg %p599_p13  ;;  %p606_p3 = por %p605_p2, %p604_p1 }
  0x25   : > { %p607_p5 = pnand %p606_p3, %p600_p0 }
  0x9b   : > { %v361_v7 = vpop.permute.xlu0 %360 }
  0x9c   : > { %v366_v12 = vrot.slane %v361_v7, %v365_v11 }
  0x9f   : > { %v372_v8 = vpop.permute.xlu0 %371 }
  0xa0   : > { %389 = vst [vmem:[%s250_s5] sm:$0xf] %v372_v8  ;;  %390 = vst [vmem:[%s250_s5 + $0x8] sm:$0xf] %v372_v8 }
  0xf2   : > { %v352_v13 = vpop.f32.mrb[0].mxu0 }
  0xf3   : > { %v367_v14 = vmul.f32 %v366_v12, %v352_v13  ;;  %v354_v15 = vpop.f32.mrb[1].mxu0 }
  0xf4   : > { %v368_v16 = vmul.f32 %v366_v12, %v354_v15 }
  0xf5   : > { %v377_v17 = vrot.slane %v367_v14, %v365_v11 }
  0xf6   : > { %v381_v18 = vrot.slane %v368_v16, %v365_v11 }
  0xf7   : > { %v382_v19 = vmul.f32 %v377_v17, %v372_v8 }
  0xf8   : > { %v383_v20 = vmul.f32 %v381_v18, %v372_v8 }
  0xfa   : > { %v386_v21 = vcombine.low %v382_v19, %v383_v20 }
  0xfc   : > { %v388_v22 = vsub.f32 %v274_v2, %v386_v21 }
  0xfe   : > { %v392_v23 = vcombine.low %v388_v22, %v388_v22  ;;  %395 = vst [vmem:[%s250_s5 + $0x8] sm:$0xf0] %v388_v22 }
 0x100   : > { %394 = vst [vmem:[%s250_s5] sm:$0xf0] %v392_v23 }
 0x101   : > { %610 = shalt.err (!%p607_p5)
}
 0x102   : > { %s611_s14 = scalar_lea.hbm %s779_s9, 256  ;;  %s615_s24 = scalar_lea.hbm %s830_s4, 512 }
 0x103   : > { %p612_p6 = scmp.ne.s32.totalorder %s779_s9, %s611_s14  ;;  %p616_p10 = scmp.lt.u32.totalorder %s779_s9, %s830_s4 }
 0x104   : > { %p617_p11 = scmp.lt.u32.totalorder %s615_s24, %s611_s14  ;;  %p619_p13 = scmp.lt.u32.totalorder %s611_s14, %s779_s9 }
 0x105   : > { %p613_p7 = pnand %p612_p6, %p745_p4 }
 0x106   : > { %p618_p12 = por %p617_p11, %p616_p10 }
 0x107   : > { %p614_p9 = pneg %p613_p7 }
 0x108   : > { %p620_p0 = por %p619_p13, %p618_p12 }
 0x10a   : > { %p621_p1 = pnand %p620_p0, %p614_p9 }
 0x10c   : > { %624 = shalt.err (!%p621_p1)
}
 0x10d   : > { %538 = dma.vmem_to_hbm [thread:$0]  (%p745_p4), %s781_s6, 256, %s779_s9, %s397_s10  }
 0x10e PF: > { %p544_p2 = scmp.ge.s32.totalorder %s675_s20, 2  ;;  %s425_s5 = sand.u32 1, %s655_s15  }
 0x10f   : > { %s426_s29 = scalar_lea.sflag [#allocation3], %s425_s5 }
 0x110   : > { %p541_p3 = pnand %p544_p2, %p752_p8 }
 0x112   : > { %650 = dma.done.wait (!%p541_p3), %s426_s29, 256  }
 0x113   : > { %652 = vsyncadd (!%p541_p3), %s426_s29, 4294967040  ;;  %s17_s20 = sadd.s32 1, %s675_s20   ;;  %s833_s15 = smov %s659_s16 }
 0x114   : > { %p14_p5 = scmp.ge.s32.totalorder %s17_s20, 4   ;;  %s834_s16 = smov %s663_s17 }
 0x115   : > { %s835_s17 = smov %s758_s28  ;;  %s836_s18 = smov %s671_s19 }
 0x116   : > { %s837_s19 = smov %s839_s23  ;;  %16 = sbr.rel (!%p14_p5) target bundleno = 4 (0x4), region = 80 }
 0x11d   :  { %431 = vsyncpa [#allocation3], 1 }
 0x11e   :  { %433 = vsyncpa [#allocation3 + $0x1], 1 }

</bundles_post_ra>
